<compile_context>
chip_gen: v5e
topology: v5e:2x2
jax: 0.10.0
libtpu: 0.0.40
codegen_flags: <defaults>
</compile_context>

<pallas_src>
import functools

import jax
import jax.numpy as jnp
from jax.experimental import pallas as pl
from jax.experimental.pallas import tpu as pltpu


def _concat_kernel(x1_ref, x2_ref, o_ref, *, f1):
    # x1_ref: (TM, F1), x2_ref: (TM, F2), o_ref: (TM, F1 + F2)
    # Two contiguous stores into disjoint lane ranges of the output tile.
    o_ref[:, :f1] = x1_ref[...]
    o_ref[:, f1:] = x2_ref[...]


def concat_dim2(x1, x2):
    """torch.cat([x1, x2], dim=2) for 3-D inputs (B, S, F1) and (B, S, F2)."""
    assert x1.ndim == 3 and x2.ndim == 3, "only the model's 3-D case is implemented"
    B, S, F1 = x1.shape
    B2, S2, F2 = x2.shape
    assert (B, S) == (B2, S2), "non-concat dims must match"
    assert x1.dtype == x2.dtype, "dtypes must match"
    Fo = F1 + F2
    dtype = x1.dtype
    itemsize = jnp.dtype(dtype).itemsize

    # Sublane packing multiple for the row (second-to-last) dim of each block.
    sub = {4: 8, 2: 16, 1: 32}.get(itemsize, 8)

    # Free, contiguous collapse of the leading dims: tile over rows = B*S.
    rows = B * S
    x1f = x1.reshape(rows, F1)
    x2f = x2.reshape(rows, F2)

    # Row-tile selection.
    #   double-buffered working set = 2*(TM*F1 + TM*F2 + TM*Fo)*bytes
    #                               = 4*TM*Fo*bytes  <= VMEM_BUDGET
    VMEM_BUDGET = 12 * 1024 * 1024          # conservative across v5e/v6e/v7x
    TARGET_ROWS = 1024                      # measured sweet spot for a pure copy
    per_row_bytes = 4 * Fo * itemsize
    max_rows_vmem = max(sub, (VMEM_BUDGET // per_row_bytes) // sub * sub)

    if rows <= min(TARGET_ROWS, max_rows_vmem):
        # Whole problem in a single block / single grid step (tiny-shape path).
        tm = rows
    else:
        tm = min(TARGET_ROWS, max_rows_vmem)
        tm = max(sub, (tm // sub) * sub)

    grid = (pl.cdiv(rows, tm),)

    # Scoped-VMEM limit sized from the actual working set, with 2x headroom,
    # clamped to a range that is valid on every generation (v7x phys = 64 MiB).
    working_set = 4 * tm * Fo * itemsize
    vmem_limit = int(min(64 << 20, max(2 * working_set, 16 << 20)))

    out_flat = pl.pallas_call(
        functools.partial(_concat_kernel, f1=F1),
        out_shape=jax.ShapeDtypeStruct((rows, Fo), dtype),
        grid=grid,
        in_specs=[
            pl.BlockSpec((tm, F1), lambda i: (i, 0)),
            pl.BlockSpec((tm, F2), lambda i: (i, 0)),
        ],
        out_specs=pl.BlockSpec((tm, Fo), lambda i: (i, 0)),
        compiler_params=pltpu.CompilerParams(
            # Row tiles are independent -> shard across v7x's 2 TensorCores.
            dimension_semantics=("parallel",),
            vmem_limit_bytes=vmem_limit,
        ),
    )(x1f, x2f)

    return out_flat.reshape(B, S, Fo)


if __name__ == "__main__":
    # Small shapes consistent with the module's usage: (batch, seq, features).
    # Feature widths lane-aligned (multiples of 128) so both output stores are
    # unmasked full-lane vst's.
    B, S, F1, F2 = 2, 16, 128, 128

    key = jax.random.PRNGKey(0)
    k1, k2 = jax.random.split(key)
    x1 = jax.random.normal(k1, (B, S, F1), dtype=jnp.float32)
    x2 = jax.random.normal(k2, (B, S, F2), dtype=jnp.float32)

    out = jax.jit(concat_dim2)(x1, x2)
    jax.block_until_ready(out)

    ref = jnp.concatenate([x1, x2], axis=2)
    assert out.shape == (B, S, F1 + F2)
    assert out.dtype == x1.dtype
    assert bool(jnp.array_equal(out, ref))
    print("KERNEL_OK")
</pallas_src>

<mosaic_0001>
module attributes {stable_mosaic.version = 11 : i64} {
  func.func @_concat_kernel(%arg0: i32, %arg1: memref<32x128xf32, #tpu.memory_space<vmem>>, %arg2: memref<32x128xf32, #tpu.memory_space<vmem>>, %arg3: memref<32x256xf32, #tpu.memory_space<vmem>>) attributes {dimension_semantics = [#tpu.dimension_semantics<parallel>], iteration_bounds = array<i64: 1>, scalar_prefetch = 0 : i64, scratch_operands = 0 : i64, tpu.core_type = #tpu.core_type<tc>, window_params = [{transform_indices = @transform_0, window_bounds = array<i64: 32, 128>}, {transform_indices = @transform_1, window_bounds = array<i64: 32, 128>}, {transform_indices = @transform_2, window_bounds = array<i64: 32, 256>}]} {
    %c0 = arith.constant 0 : index
    %c0_0 = arith.constant 0 : index
    %0 = vector.load %arg1[%c0, %c0_0] : memref<32x128xf32, #tpu.memory_space<vmem>>, vector<32x128xf32>
    %c0_1 = arith.constant 0 : index
    %c0_2 = arith.constant 0 : index
    %1 = vector.load %arg3[%c0_1, %c0_2] : memref<32x256xf32, #tpu.memory_space<vmem>>, vector<32x128xf32>
    tpu.vector_store %arg3[%c0_1, %c0_2], %0 {strides = array<i32>} : memref<32x256xf32, #tpu.memory_space<vmem>>, vector<32x128xf32>,
    %c0_3 = arith.constant 0 : index
    %c0_4 = arith.constant 0 : index
    %2 = vector.load %arg2[%c0_3, %c0_4] : memref<32x128xf32, #tpu.memory_space<vmem>>, vector<32x128xf32>
    %c0_5 = arith.constant 0 : index
    %c128 = arith.constant 128 : index
    %3 = vector.load %arg3[%c0_5, %c128] : memref<32x256xf32, #tpu.memory_space<vmem>>, vector<32x128xf32>
    tpu.vector_store %arg3[%c0_5, %c128], %2 {strides = array<i32>} : memref<32x256xf32, #tpu.memory_space<vmem>>, vector<32x128xf32>,
    return
  }
  func.func @transform_0(%arg0: i32) -> (i32, i32) {
    %c0_i32 = arith.constant 0 : i32
    %c0_i32_0 = arith.constant 0 : i32
    return %arg0, %c0_i32 : i32, i32
  }
  func.func @transform_1(%arg0: i32) -> (i32, i32) {
    %c0_i32 = arith.constant 0 : i32
    %c0_i32_0 = arith.constant 0 : i32
    return %arg0, %c0_i32 : i32, i32
  }
  func.func @transform_2(%arg0: i32) -> (i32, i32) {
    %c0_i32 = arith.constant 0 : i32
    %c0_i32_0 = arith.constant 0 : i32
    return %arg0, %c0_i32 : i32, i32
  }
}

</mosaic_0001>

<bundles_post_ra>
// kernel: concat_dim2.1
= control target key start
LH: loop header
LB: loop body
LE: loop exit
PB: predicated region body
PF: predicated region fallthrough
CT: control target
= control target key end

     0   :  { %7 = vsyncpa [#allocation3], 0  ;;  %s196_s0 = inlined_call_operand.hbm [shape: f32[32,128], index: 0, kind: input, shape index: {}]   ;;  %s197_s1 = inlined_call_operand.hbm [shape: f32[32,128], index: 1, kind: input, shape index: {}]   ;;  %s198_s2 = inlined_call_operand.hbm [shape: f32[32,256], index: 2, kind: output, shape index: {}]  }
   0x1   :  { %8 = vsyncpa [#allocation6], 0 }
   0x2   :  { %9 = vsyncpa [#allocation4], 0  ;;  %s14_s11 = sshll.u32 %s196_s0, 4  ;;  %s165_s12 = smov [#allocation2]   ;;  %s15_s11 = int_to_ptr.hbm [resolvable:$true] %s14_s11 }
   0x3   :  { %s16_s13 = sshll.u32 %s165_s12, 4  ;;  %s27_s16 = sshll.u32 %s197_s1, 4  ;;  %s17_s13 = int_to_ptr.vmem [resolvable:$true] %s16_s13  ;;  %s28_s16 = int_to_ptr.hbm [resolvable:$true] %s27_s16 }
   0x4   :  { %s166_s17 = smov 128   ;;  %s167_s18 = smov 8  }
   0x5   :  { %22 = dma.hbm_to_vmem [thread:$0]  %s15_s11, 512, %s17_s13, [#allocation3], %s166_s17, %s166_s17, %s167_s18  }
   0x6   :  { %s168_s19 = smov [#allocation5]  }
   0x7   :  { %s29_s20 = sshll.u32 %s168_s19, 4  ;;  %s30_s20 = int_to_ptr.vmem [resolvable:$true] %s29_s20 }
   0x8   :  { %35 = dma.hbm_to_vmem [thread:$0]  %s28_s16, 512, %s30_s20, [#allocation6], %s166_s17, %s166_s17, %s167_s18  }
   0x9   :  { %159 = dma.done.wait [#allocation3], 512  }
   0xa   :  { %160 = vsyncadd [#allocation3], 4294966784 }
   0xb   :  { %161 = dma.done.wait [#allocation6], 512  }
   0xc   :  { %162 = vsyncadd [#allocation6], 4294966784  ;;  %v44_v0 = vld [vmem:[#allocation2] sm:$0xff]  ;;  %v45_v1 = vld [vmem:[#allocation2 + $0x8] sm:$0xff]  ;;  %s169_s0 = smov [#allocation7]   ;;  %s66_s23 = sshll.u32 %s198_s2, 4  ;;  %s67_s23 = int_to_ptr.hbm [resolvable:$true] %s66_s23 }
   0xd   :  { %v46_v2 = vld [vmem:[#allocation2 + $0x10] sm:$0xff]  ;;  %48 = vst [vmem:[#allocation7] sm:$0xff] %v44_v0  ;;  %v47_v3 = vld [vmem:[#allocation2 + $0x18] sm:$0xff]  ;;  %v52_v4 = vld [vmem:[#allocation5] sm:$0xff]  ;;  %s64_s1 = sshll.u32 %s169_s0, 4  ;;  %s170_s24 = smov 256   ;;  %s65_s1 = int_to_ptr.vmem [resolvable:$true] %s64_s1 }
   0xe   :  { %49 = vst [vmem:[#allocation7 + $0x10] sm:$0xff] %v45_v1  ;;  %v53_v5 = vld [vmem:[#allocation5 + $0x8] sm:$0xff]  ;;  %v54_v6 = vld [vmem:[#allocation5 + $0x10] sm:$0xff]  ;;  %v55_v7 = vld [vmem:[#allocation5 + $0x18] sm:$0xff]  ;;  %s171_s25 = smov 16  }
   0xf   :  { %50 = vst [vmem:[#allocation7 + $0x20] sm:$0xff] %v46_v2 }
  0x10   :  { %51 = vst [vmem:[#allocation7 + $0x30] sm:$0xff] %v47_v3 }
  0x11   :  { %56 = vst [vmem:[#allocation7 + $0x8] sm:$0xff] %v52_v4 }
  0x12   :  { %57 = vst [vmem:[#allocation7 + $0x18] sm:$0xff] %v53_v5 }
  0x13   :  { %58 = vst [vmem:[#allocation7 + $0x28] sm:$0xff] %v54_v6 }
  0x14   :  { %59 = vst [vmem:[#allocation7 + $0x38] sm:$0xff] %v55_v7 }
  0x15   :  { %72 = dma.vmem_to_hbm [thread:$0]  %s65_s1, 1024, %s67_s23, [#allocation4], %s170_s24, %s170_s24, %s171_s25  }
  0x16   :  { %163 = dma.done.wait [#allocation4], 1024  }
  0x17   :  { %164 = vsyncadd [#allocation4], 4294966272 }
  0x18   :  { %77 = vsyncpa [#allocation3], 1 }
  0x19   :  { %78 = vsyncpa [#allocation6], 1 }
  0x1a   :  { %79 = vsyncpa [#allocation4], 1 }

</bundles_post_ra>
